<compile_context>
chip_gen: v7x
topology: tpu7x:2x2x1
jax: 0.10.0
libtpu: 0.0.40
codegen_flags: <defaults>
</compile_context>

<pallas_src>
import functools

import numpy as np
import jax
import jax.numpy as jnp
from jax.experimental import pallas as pl
from jax.experimental.pallas import tpu as pltpu

LN_EPS = 1e-5
NEG_INF = -1e30  # large-but-safe mask fill (robust even if scores go bf16)


def _mca_kernel(y_ref, tt_ref, jm_ref, vis_ref, lnw_ref, lnb_ref,
                wq_ref, wk_ref, wv_ref, wo_ref, out_ref, k_sc, v_sc,
                *, heads, mxu_dtype, approx_recip):
    f32 = jnp.float32

    # ---- per-head K / V projections: once per batch, cached across token tiles ----
    @pl.when(pl.program_id(1) == 0)
    def _():
        vis_c = vis_ref[0].astype(mxu_dtype)            # (KV, Dv)
        for h in range(heads):
            k_sc[h] = jnp.dot(vis_c, wk_ref[h],
                              preferred_element_type=f32).astype(mxu_dtype)
            v_sc[h] = jnp.dot(vis_c, wv_ref[h],
                              preferred_element_type=f32).astype(mxu_dtype)

    y = y_ref[0].astype(f32)            # (tT, D)
    tt = tt_ref[0]                      # (tT, 1) int32 cumulative media count
    jm = jm_ref[...]                    # (1, KV)  int32 media index of each kv slot

    # ---- LayerNorm(dim), f32 ----
    mean = jnp.mean(y, axis=-1, keepdims=True)
    xc = y - mean
    var = jnp.mean(xc * xc, axis=-1, keepdims=True)
    y_n = xc * jax.lax.rsqrt(var + LN_EPS) * lnw_ref[...] + lnb_ref[...]
    y_c = y_n.astype(mxu_dtype)

    # ---- text-to-media mask (computed once, reused by every head) ----
    attend = tt == jm                   # (tT, KV) bool
    no_media = tt == 0                  # (tT, 1)  bool

    tT, D = y.shape
    cond = jnp.zeros((tT, D), f32)

    # ---- per-head attention, fused output projection ----
    for h in range(heads):
        qh = jnp.dot(y_c, wq_ref[h], preferred_element_type=f32)     # (tT, dh)
        kh = k_sc[h]                                                  # (KV, dh) mxu_dtype
        vh = v_sc[h]                                                  # (KV, dh) mxu_dtype

        sim = jax.lax.dot_general(
            qh.astype(mxu_dtype), kh,
            (((1,), (1,)), ((), ())),
            preferred_element_type=f32)                               # (tT, KV)
        sim = jnp.where(attend, sim, NEG_INF)
        m = jnp.max(sim, axis=-1, keepdims=True)
        p = jnp.exp(sim - m)
        denom = jnp.sum(p, axis=-1, keepdims=True)
        if approx_recip:
            alphas = p * pl.reciprocal(denom, approx=True)            # (tT, KV)
        else:
            alphas = p / denom

        attn = jnp.dot(alphas.astype(mxu_dtype), vh,
                       preferred_element_type=f32)                    # (tT, dh)
        cond = cond + jnp.dot(attn.astype(mxu_dtype), wo_ref[h],
                              preferred_element_type=f32)             # (tT, D)

    # tokens with no preceding media attend to nothing -> zero rows (done once).
    cond = jnp.where(no_media, 0.0, cond)
    out_ref[0] = cond.astype(out_ref.dtype)


def _pick_token_tile(T, cap=256):
    """Largest multiple-of-8 divisor of T up to `cap` (or T itself)."""
    if T <= cap:
        return T
    t = cap - (cap % 8)
    while t >= 8:
        if T % t == 0:
            return t
        t -= 8
    return T


def masked_cross_attention(y, media_locations, visual_features, params, *,
                           heads, dim_head, n_visual,
                           mxu_dtype=jnp.bfloat16, token_tile=None):
    """Pallas implementation of MaskedCrossAttention.forward (previous_kv=None)."""
    B, T, D = y.shape
    _, M, Nq, Dv = visual_features.shape
    assert Nq == n_visual
    KV = M * Nq
    inner = heads * dim_head
    scale = dim_head ** (-0.5)

    # --- setup-time weight massaging (free, done once per call site) ---
    # fold the attention scale into w_q; split to_kv into K and V halves;
    # re-layout every projection as per-head 2-D matrices.
    wq = (params["w_q"] * scale).reshape(D, heads, dim_head)
    wq3 = jnp.transpose(wq, (1, 0, 2)).astype(mxu_dtype)                 # (H, D, dh)
    wk = params["w_kv"][:, :inner].reshape(Dv, heads, dim_head)
    wv = params["w_kv"][:, inner:].reshape(Dv, heads, dim_head)
    wk3 = jnp.transpose(wk, (1, 0, 2)).astype(mxu_dtype)                 # (H, Dv, dh)
    wv3 = jnp.transpose(wv, (1, 0, 2)).astype(mxu_dtype)                 # (H, Dv, dh)
    wo3 = params["w_out"].reshape(heads, dim_head, D).astype(mxu_dtype)  # (H, dh, D)

    lnw = params["ln_w"].astype(jnp.float32)[None, :]                    # (1, D)
    lnb = params["ln_b"].astype(jnp.float32)[None, :]                    # (1, D)

    # glue: flatten images; cumulative media count (== torch cumsum); per-kv media id.
    vis_flat = visual_features.reshape(B, KV, Dv)
    text_time = jnp.cumsum(media_locations.astype(jnp.int32), axis=-1)[..., None]  # (B,T,1)
    j_media = jnp.repeat(jnp.arange(1, M + 1, dtype=jnp.int32), Nq)[None, :]        # (1,KV)

    tT = token_tile if token_tile is not None else _pick_token_tile(T)
    nT = pl.cdiv(T, tT)

    approx_recip = np.dtype(mxu_dtype) != np.dtype(np.float32)
    kernel = functools.partial(_mca_kernel, heads=heads, mxu_dtype=mxu_dtype,
                               approx_recip=approx_recip)

    grid_spec = pltpu.PrefetchScalarGridSpec(
        num_scalar_prefetch=0,
        grid=(B, nT),
        in_specs=[
            pl.BlockSpec((1, tT, D), lambda b, t: (b, t, 0)),             # y
            pl.BlockSpec((1, tT, 1), lambda b, t: (b, t, 0)),             # text_time
            pl.BlockSpec((1, KV), lambda b, t: (0, 0)),                   # j_media
            pl.BlockSpec((1, KV, Dv), lambda b, t: (b, 0, 0)),            # visual
            pl.BlockSpec((1, D), lambda b, t: (0, 0)),                    # ln_w
            pl.BlockSpec((1, D), lambda b, t: (0, 0)),                    # ln_b
            pl.BlockSpec((heads, D, dim_head), lambda b, t: (0, 0, 0)),     # wq3
            pl.BlockSpec((heads, Dv, dim_head), lambda b, t: (0, 0, 0)),    # wk3
            pl.BlockSpec((heads, Dv, dim_head), lambda b, t: (0, 0, 0)),    # wv3
            pl.BlockSpec((heads, dim_head, D), lambda b, t: (0, 0, 0)),     # wo3
        ],
        out_specs=pl.BlockSpec((1, tT, D), lambda b, t: (b, t, 0)),
        scratch_shapes=[
            pltpu.VMEM((heads, KV, dim_head), mxu_dtype),                 # K cache
            pltpu.VMEM((heads, KV, dim_head), mxu_dtype),                 # V cache
        ],
    )

    return pl.pallas_call(
        kernel,
        out_shape=jax.ShapeDtypeStruct((B, T, D), y.dtype),
        grid_spec=grid_spec,
        compiler_params=pltpu.CompilerParams(
            dimension_semantics=("parallel", "arbitrary"),
            vmem_limit_bytes=32 * 1024 * 1024,
        ),
    )(y, text_time, j_media, vis_flat, lnw, lnb, wq3, wk3, wv3, wo3)


def reference(y, media_locations, visual_features, params, *, heads, dim_head,
              n_visual):
    """Pure-JAX mirror of the PyTorch forward, for validation."""
    B, T, D = y.shape
    _, M, Nq, Dv = visual_features.shape
    inner = heads * dim_head
    scale = dim_head ** (-0.5)

    mean = jnp.mean(y, axis=-1, keepdims=True)
    var = jnp.mean((y - mean) ** 2, axis=-1, keepdims=True)
    y_n = (y - mean) / jnp.sqrt(var + LN_EPS) * params["ln_w"] + params["ln_b"]

    q = (y_n @ params["w_q"]) * scale                               # (B, T, inner)
    vis = visual_features.reshape(B, M * Nq, Dv)
    kv = vis @ params["w_kv"]
    k, v = kv[..., :inner], kv[..., inner:]

    def split_heads(x):
        return x.reshape(B, -1, heads, dim_head).transpose(0, 2, 1, 3)

    q, k, v = split_heads(q), split_heads(k), split_heads(v)
    sim = jnp.einsum("bhid,bhjd->bhij", q, k)

    text_time = jnp.cumsum(media_locations.astype(jnp.int32), axis=-1)  # (B, T)
    media_time = jnp.arange(M) + 1
    mask = text_time[:, None, :, None] == jnp.repeat(media_time, n_visual)[None, None, None, :]
    sim = jnp.where(mask, sim, -jnp.finfo(sim.dtype).max)
    sim = sim - jnp.max(sim, axis=-1, keepdims=True)
    alphas = jax.nn.softmax(sim, axis=-1)
    alphas = jnp.where((text_time == 0)[:, None, :, None], 0.0, alphas)
    out = jnp.einsum("bhij,bhjd->bhid", alphas, v)
    out = out.transpose(0, 2, 1, 3).reshape(B, T, inner)
    return out @ params["w_out"]


if __name__ == "__main__":
    # Small, deterministic config.
    B, T, D = 2, 8, 32          # batch, tokens, d_token
    Dv = 16                     # d_visual
    heads, dim_head = 4, 8      # inner_dim = 32
    M, Nq = 2, 4                # n_images, n_queries (n_visual = Nq)
    inner = heads * dim_head

    key = jax.random.PRNGKey(0)
    k_y, k_v, k_q, k_kv, k_o, k_lw, k_lb = jax.random.split(key, 7)

    y = jax.random.normal(k_y, (B, T, D), dtype=jnp.float32)
    visual_features = jax.random.normal(k_v, (B, M, Nq, Dv), dtype=jnp.float32)
    media_locations = jnp.array(
        [[1, 0, 0, 0, 1, 0, 0, 0],
         [0, 1, 0, 0, 0, 1, 0, 0]], dtype=jnp.bool_)

    params = {
        "ln_w": 1.0 + 0.1 * jax.random.normal(k_lw, (D,), dtype=jnp.float32),
        "ln_b": 0.1 * jax.random.normal(k_lb, (D,), dtype=jnp.float32),
        "w_q": 0.05 * jax.random.normal(k_q, (D, inner), dtype=jnp.float32),
        "w_kv": 0.05 * jax.random.normal(k_kv, (Dv, 2 * inner), dtype=jnp.float32),
        "w_out": 0.05 * jax.random.normal(k_o, (inner, D), dtype=jnp.float32),
    }

    ref = reference(y, media_locations, visual_features, params,
                    heads=heads, dim_head=dim_head, n_visual=Nq)

    # f32 MXU operands (v5e-style path) — tight check vs pure-JAX reference.
    out_f32 = masked_cross_attention(y, media_locations, visual_features, params,
                                     heads=heads, dim_head=dim_head, n_visual=Nq,
                                     mxu_dtype=jnp.float32)
    out_f32 = jax.block_until_ready(out_f32)
    assert out_f32.shape == (B, T, D)
    assert jnp.allclose(out_f32, ref, atol=2e-3, rtol=2e-3), "f32 mismatch vs ref"

    # bf16 MXU operands (default; fast path on v6e/v7x) — loose check.
    out_bf16 = masked_cross_attention(y, media_locations, visual_features, params,
                                      heads=heads, dim_head=dim_head, n_visual=Nq)
    out_bf16 = jax.block_until_ready(out_bf16)
    assert out_bf16.shape == (B, T, D)
    assert jnp.allclose(out_bf16, ref, atol=5e-2, rtol=5e-2), "bf16 mismatch vs ref"

    print("KERNEL_OK")
</pallas_src>

<mosaic_0001>
module attributes {stable_mosaic.version = 11 : i64} {
  func.func @_mca_kernel(%arg0: i32, %arg1: i32, %arg2: memref<1x8x32xf32, #tpu.memory_space<vmem>>, %arg3: memref<1x8x1xi32, #tpu.memory_space<vmem>>, %arg4: memref<1x8xi32, #tpu.memory_space<vmem>>, %arg5: memref<1x8x16xf32, #tpu.memory_space<vmem>>, %arg6: memref<1x32xf32, #tpu.memory_space<vmem>>, %arg7: memref<1x32xf32, #tpu.memory_space<vmem>>, %arg8: memref<4x32x8xf32, #tpu.memory_space<vmem>>, %arg9: memref<4x16x8xf32, #tpu.memory_space<vmem>>, %arg10: memref<4x16x8xf32, #tpu.memory_space<vmem>>, %arg11: memref<4x8x32xf32, #tpu.memory_space<vmem>>, %arg12: memref<1x8x32xf32, #tpu.memory_space<vmem>>, %arg13: memref<4x8x8xf32, #tpu.memory_space<vmem>>, %arg14: memref<4x8x8xf32, #tpu.memory_space<vmem>>) attributes {dimension_semantics = [#tpu.dimension_semantics<parallel>, #tpu.dimension_semantics<arbitrary>], iteration_bounds = array<i64: 2, 1>, scalar_prefetch = 0 : i64, scratch_operands = 2 : i64, tpu.core_type = #tpu.core_type<tc>, window_params = [{transform_indices = @transform_0, window_bounds = array<i64: 1, 8, 32>}, {transform_indices = @transform_1, window_bounds = array<i64: 1, 8, 1>}, {pipeline_mode = #tpu.pipeline_mode<synchronous>, transform_indices = @transform_2, window_bounds = array<i64: 1, 8>}, {transform_indices = @transform_3, window_bounds = array<i64: 1, 8, 16>}, {pipeline_mode = #tpu.pipeline_mode<synchronous>, transform_indices = @transform_4, window_bounds = array<i64: 1, 32>}, {pipeline_mode = #tpu.pipeline_mode<synchronous>, transform_indices = @transform_5, window_bounds = array<i64: 1, 32>}, {pipeline_mode = #tpu.pipeline_mode<synchronous>, transform_indices = @transform_6, window_bounds = array<i64: 4, 32, 8>}, {pipeline_mode = #tpu.pipeline_mode<synchronous>, transform_indices = @transform_7, window_bounds = array<i64: 4, 16, 8>}, {pipeline_mode = #tpu.pipeline_mode<synchronous>, transform_indices = @transform_8, window_bounds = array<i64: 4, 16, 8>}, {pipeline_mode = #tpu.pipeline_mode<synchronous>, transform_indices = @transform_9, window_bounds = array<i64: 4, 8, 32>}, {transform_indices = @transform_10, window_bounds = array<i64: 1, 8, 32>}]} {
    %c0_i32 = arith.constant 0 : i32
    %0 = arith.cmpi eq, %arg1, %c0_i32 : i32
    %1 = arith.extui %0 : i1 to i32
    %c0_i32_0 = arith.constant 0 : i32
    %2 = arith.cmpi ne, %1, %c0_i32_0 : i32
    scf.if %2 {
      %c0_95 = arith.constant 0 : index
      %c0_96 = arith.constant 0 : index
      %c0_97 = arith.constant 0 : index
      %139 = vector.load %arg5[%c0_95, %c0_96, %c0_97] : memref<1x8x16xf32, #tpu.memory_space<vmem>>, vector<1x8x16xf32>
      %140 = vector.shape_cast %139 : vector<1x8x16xf32> to vector<8x16xf32>
      %c0_98 = arith.constant 0 : index
      %c0_99 = arith.constant 0 : index
      %c0_100 = arith.constant 0 : index
      %141 = vector.load %arg9[%c0_98, %c0_99, %c0_100] : memref<4x16x8xf32, #tpu.memory_space<vmem>>, vector<1x16x8xf32>
      %142 = vector.shape_cast %141 : vector<1x16x8xf32> to vector<16x8xf32>
      %cst_101 = arith.constant dense<0.000000e+00> : vector<8x8xf32>
      %143 = tpu.matmul %140, %142, %cst_101 {dimension_numbers = #tpu.dot_dimension_numbers<[1], [0], [0], [1], [0, 0, 1, 1], [], []>} : vector<8x16xf32>, vector<16x8xf32>, vector<8x8xf32> -> vector<8x8xf32>
      %c0_102 = arith.constant 0 : index
      %c0_103 = arith.constant 0 : index
      %c0_104 = arith.constant 0 : index
      %144 = vector.load %arg13[%c0_102, %c0_103, %c0_104] : memref<4x8x8xf32, #tpu.memory_space<vmem>>, vector<1x8x8xf32>
      %145 = vector.shape_cast %144 : vector<1x8x8xf32> to vector<8x8xf32>
      %146 = vector.shape_cast %143 : vector<8x8xf32> to vector<1x8x8xf32>
      tpu.vector_store %arg13[%c0_102, %c0_103, %c0_104], %146 {strides = array<i32>} : memref<4x8x8xf32, #tpu.memory_space<vmem>>, vector<1x8x8xf32>,
      %c0_105 = arith.constant 0 : index
      %c0_106 = arith.constant 0 : index
      %c0_107 = arith.constant 0 : index
      %147 = vector.load %arg10[%c0_105, %c0_106, %c0_107] : memref<4x16x8xf32, #tpu.memory_space<vmem>>, vector<1x16x8xf32>
      %148 = vector.shape_cast %147 : vector<1x16x8xf32> to vector<16x8xf32>
      %cst_108 = arith.constant dense<0.000000e+00> : vector<8x8xf32>
      %149 = tpu.matmul %140, %148, %cst_108 {dimension_numbers = #tpu.dot_dimension_numbers<[1], [0], [0], [1], [0, 0, 1, 1], [], []>} : vector<8x16xf32>, vector<16x8xf32>, vector<8x8xf32> -> vector<8x8xf32>
      %c0_109 = arith.constant 0 : index
      %c0_110 = arith.constant 0 : index
      %c0_111 = arith.constant 0 : index
      %150 = vector.load %arg14[%c0_109, %c0_110, %c0_111] : memref<4x8x8xf32, #tpu.memory_space<vmem>>, vector<1x8x8xf32>
      %151 = vector.shape_cast %150 : vector<1x8x8xf32> to vector<8x8xf32>
      %152 = vector.shape_cast %149 : vector<8x8xf32> to vector<1x8x8xf32>
      tpu.vector_store %arg14[%c0_109, %c0_110, %c0_111], %152 {strides = array<i32>} : memref<4x8x8xf32, #tpu.memory_space<vmem>>, vector<1x8x8xf32>,
      %c1_112 = arith.constant 1 : index
      %c0_113 = arith.constant 0 : index
      %c0_114 = arith.constant 0 : index
      %153 = vector.load %arg9[%c1_112, %c0_113, %c0_114] : memref<4x16x8xf32, #tpu.memory_space<vmem>>, vector<1x16x8xf32>
      %154 = vector.shape_cast %153 : vector<1x16x8xf32> to vector<16x8xf32>
      %cst_115 = arith.constant dense<0.000000e+00> : vector<8x8xf32>
      %155 = tpu.matmul %140, %154, %cst_115 {dimension_numbers = #tpu.dot_dimension_numbers<[1], [0], [0], [1], [0, 0, 1, 1], [], []>} : vector<8x16xf32>, vector<16x8xf32>, vector<8x8xf32> -> vector<8x8xf32>
      %c1_116 = arith.constant 1 : index
      %c0_117 = arith.constant 0 : index
      %c0_118 = arith.constant 0 : index
      %156 = vector.load %arg13[%c1_116, %c0_117, %c0_118] : memref<4x8x8xf32, #tpu.memory_space<vmem>>, vector<1x8x8xf32>
      %157 = vector.shape_cast %156 : vector<1x8x8xf32> to vector<8x8xf32>
      %158 = vector.shape_cast %155 : vector<8x8xf32> to vector<1x8x8xf32>
      tpu.vector_store %arg13[%c1_116, %c0_117, %c0_118], %158 {strides = array<i32>} : memref<4x8x8xf32, #tpu.memory_space<vmem>>, vector<1x8x8xf32>,
      %c1_119 = arith.constant 1 : index
      %c0_120 = arith.constant 0 : index
      %c0_121 = arith.constant 0 : index
      %159 = vector.load %arg10[%c1_119, %c0_120, %c0_121] : memref<4x16x8xf32, #tpu.memory_space<vmem>>, vector<1x16x8xf32>
      %160 = vector.shape_cast %159 : vector<1x16x8xf32> to vector<16x8xf32>
      %cst_122 = arith.constant dense<0.000000e+00> : vector<8x8xf32>
      %161 = tpu.matmul %140, %160, %cst_122 {dimension_numbers = #tpu.dot_dimension_numbers<[1], [0], [0], [1], [0, 0, 1, 1], [], []>} : vector<8x16xf32>, vector<16x8xf32>, vector<8x8xf32> -> vector<8x8xf32>
      %c1_123 = arith.constant 1 : index
      %c0_124 = arith.constant 0 : index
      %c0_125 = arith.constant 0 : index
      %162 = vector.load %arg14[%c1_123, %c0_124, %c0_125] : memref<4x8x8xf32, #tpu.memory_space<vmem>>, vector<1x8x8xf32>
      %163 = vector.shape_cast %162 : vector<1x8x8xf32> to vector<8x8xf32>
      %164 = vector.shape_cast %161 : vector<8x8xf32> to vector<1x8x8xf32>
      tpu.vector_store %arg14[%c1_123, %c0_124, %c0_125], %164 {strides = array<i32>} : memref<4x8x8xf32, #tpu.memory_space<vmem>>, vector<1x8x8xf32>,
      %c2_126 = arith.constant 2 : index
      %c0_127 = arith.constant 0 : index
      %c0_128 = arith.constant 0 : index
      %165 = vector.load %arg9[%c2_126, %c0_127, %c0_128] : memref<4x16x8xf32, #tpu.memory_space<vmem>>, vector<1x16x8xf32>
      %166 = vector.shape_cast %165 : vector<1x16x8xf32> to vector<16x8xf32>
      %cst_129 = arith.constant dense<0.000000e+00> : vector<8x8xf32>
      %167 = tpu.matmul %140, %166, %cst_129 {dimension_numbers = #tpu.dot_dimension_numbers<[1], [0], [0], [1], [0, 0, 1, 1], [], []>} : vector<8x16xf32>, vector<16x8xf32>, vector<8x8xf32> -> vector<8x8xf32>
      %c2_130 = arith.constant 2 : index
      %c0_131 = arith.constant 0 : index
      %c0_132 = arith.constant 0 : index
      %168 = vector.load %arg13[%c2_130, %c0_131, %c0_132] : memref<4x8x8xf32, #tpu.memory_space<vmem>>, vector<1x8x8xf32>
      %169 = vector.shape_cast %168 : vector<1x8x8xf32> to vector<8x8xf32>
      %170 = vector.shape_cast %167 : vector<8x8xf32> to vector<1x8x8xf32>
      tpu.vector_store %arg13[%c2_130, %c0_131, %c0_132], %170 {strides = array<i32>} : memref<4x8x8xf32, #tpu.memory_space<vmem>>, vector<1x8x8xf32>,
      %c2_133 = arith.constant 2 : index
      %c0_134 = arith.constant 0 : index
      %c0_135 = arith.constant 0 : index
      %171 = vector.load %arg10[%c2_133, %c0_134, %c0_135] : memref<4x16x8xf32, #tpu.memory_space<vmem>>, vector<1x16x8xf32>
      %172 = vector.shape_cast %171 : vector<1x16x8xf32> to vector<16x8xf32>
      %cst_136 = arith.constant dense<0.000000e+00> : vector<8x8xf32>
      %173 = tpu.matmul %140, %172, %cst_136 {dimension_numbers = #tpu.dot_dimension_numbers<[1], [0], [0], [1], [0, 0, 1, 1], [], []>} : vector<8x16xf32>, vector<16x8xf32>, vector<8x8xf32> -> vector<8x8xf32>
      %c2_137 = arith.constant 2 : index
      %c0_138 = arith.constant 0 : index
      %c0_139 = arith.constant 0 : index
      %174 = vector.load %arg14[%c2_137, %c0_138, %c0_139] : memref<4x8x8xf32, #tpu.memory_space<vmem>>, vector<1x8x8xf32>
      %175 = vector.shape_cast %174 : vector<1x8x8xf32> to vector<8x8xf32>
      %176 = vector.shape_cast %173 : vector<8x8xf32> to vector<1x8x8xf32>
      tpu.vector_store %arg14[%c2_137, %c0_138, %c0_139], %176 {strides = array<i32>} : memref<4x8x8xf32, #tpu.memory_space<vmem>>, vector<1x8x8xf32>,
      %c3_140 = arith.constant 3 : index
      %c0_141 = arith.constant 0 : index
      %c0_142 = arith.constant 0 : index
      %177 = vector.load %arg9[%c3_140, %c0_141, %c0_142] : memref<4x16x8xf32, #tpu.memory_space<vmem>>, vector<1x16x8xf32>
      %178 = vector.shape_cast %177 : vector<1x16x8xf32> to vector<16x8xf32>
      %cst_143 = arith.constant dense<0.000000e+00> : vector<8x8xf32>
      %179 = tpu.matmul %140, %178, %cst_143 {dimension_numbers = #tpu.dot_dimension_numbers<[1], [0], [0], [1], [0, 0, 1, 1], [], []>} : vector<8x16xf32>, vector<16x8xf32>, vector<8x8xf32> -> vector<8x8xf32>
      %c3_144 = arith.constant 3 : index
      %c0_145 = arith.constant 0 : index
      %c0_146 = arith.constant 0 : index
      %180 = vector.load %arg13[%c3_144, %c0_145, %c0_146] : memref<4x8x8xf32, #tpu.memory_space<vmem>>, vector<1x8x8xf32>
      %181 = vector.shape_cast %180 : vector<1x8x8xf32> to vector<8x8xf32>
      %182 = vector.shape_cast %179 : vector<8x8xf32> to vector<1x8x8xf32>
      tpu.vector_store %arg13[%c3_144, %c0_145, %c0_146], %182 {strides = array<i32>} : memref<4x8x8xf32, #tpu.memory_space<vmem>>, vector<1x8x8xf32>,
      %c3_147 = arith.constant 3 : index
      %c0_148 = arith.constant 0 : index
      %c0_149 = arith.constant 0 : index
      %183 = vector.load %arg10[%c3_147, %c0_148, %c0_149] : memref<4x16x8xf32, #tpu.memory_space<vmem>>, vector<1x16x8xf32>
      %184 = vector.shape_cast %183 : vector<1x16x8xf32> to vector<16x8xf32>
      %cst_150 = arith.constant dense<0.000000e+00> : vector<8x8xf32>
      %185 = tpu.matmul %140, %184, %cst_150 {dimension_numbers = #tpu.dot_dimension_numbers<[1], [0], [0], [1], [0, 0, 1, 1], [], []>} : vector<8x16xf32>, vector<16x8xf32>, vector<8x8xf32> -> vector<8x8xf32>
      %c3_151 = arith.constant 3 : index
      %c0_152 = arith.constant 0 : index
      %c0_153 = arith.constant 0 : index
      %186 = vector.load %arg14[%c3_151, %c0_152, %c0_153] : memref<4x8x8xf32, #tpu.memory_space<vmem>>, vector<1x8x8xf32>
      %187 = vector.shape_cast %186 : vector<1x8x8xf32> to vector<8x8xf32>
      %188 = vector.shape_cast %185 : vector<8x8xf32> to vector<1x8x8xf32>
      tpu.vector_store %arg14[%c3_151, %c0_152, %c0_153], %188 {strides = array<i32>} : memref<4x8x8xf32, #tpu.memory_space<vmem>>, vector<1x8x8xf32>,
    } else {
    }
    %c0 = arith.constant 0 : index
    %c0_1 = arith.constant 0 : index
    %c0_2 = arith.constant 0 : index
    %3 = vector.load %arg2[%c0, %c0_1, %c0_2] : memref<1x8x32xf32, #tpu.memory_space<vmem>>, vector<1x8x32xf32>
    %4 = vector.shape_cast %3 : vector<1x8x32xf32> to vector<8x32xf32>
    %c0_3 = arith.constant 0 : index
    %c0_4 = arith.constant 0 : index
    %c0_5 = arith.constant 0 : index
    %5 = vector.load %arg3[%c0_3, %c0_4, %c0_5] : memref<1x8x1xi32, #tpu.memory_space<vmem>>, vector<1x8x1xi32>
    %6 = vector.shape_cast %5 : vector<1x8x1xi32> to vector<8x1xi32>
    %c0_6 = arith.constant 0 : index
    %c0_7 = arith.constant 0 : index
    %7 = vector.load %arg4[%c0_6, %c0_7] : memref<1x8xi32, #tpu.memory_space<vmem>>, vector<1x8xi32>
    %cst = arith.constant dense<0.000000e+00> : vector<8xf32>
    %8 = vector.multi_reduction <add>, %4, %cst [1] : vector<8x32xf32> to vector<8xf32>
    %9 = vector.shape_cast %8 : vector<8xf32> to vector<8x1xf32>
    %cst_8 = arith.constant 3.200000e+01 : f32
    %10 = vector.broadcast %cst_8 : f32 to vector<8x1xf32>
    %11 = arith.divf %9, %10 : vector<8x1xf32>
    %12 = vector.broadcast %11 : vector<8x1xf32> to vector<8x32xf32>
    %13 = arith.subf %4, %12 : vector<8x32xf32>
    %14 = arith.mulf %13, %13 : vector<8x32xf32>
    %cst_9 = arith.constant dense<0.000000e+00> : vector<8xf32>
    %15 = vector.multi_reduction <add>, %14, %cst_9 [1] : vector<8x32xf32> to vector<8xf32>
    %16 = vector.shape_cast %15 : vector<8xf32> to vector<8x1xf32>
    %cst_10 = arith.constant 3.200000e+01 : f32
    %17 = vector.broadcast %cst_10 : f32 to vector<8x1xf32>
    %18 = arith.divf %16, %17 : vector<8x1xf32>
    %cst_11 = arith.constant 9.99999974E-6 : f32
    %19 = vector.broadcast %cst_11 : f32 to vector<8x1xf32>
    %20 = arith.addf %18, %19 : vector<8x1xf32>
    %21 = math.rsqrt %20 : vector<8x1xf32>
    %22 = vector.broadcast %21 : vector<8x1xf32> to vector<8x32xf32>
    %23 = arith.mulf %13, %22 : vector<8x32xf32>
    %c0_12 = arith.constant 0 : index
    %c0_13 = arith.constant 0 : index
    %24 = vector.load %arg6[%c0_12, %c0_13] : memref<1x32xf32, #tpu.memory_space<vmem>>, vector<1x32xf32>
    %25 = vector.broadcast %24 : vector<1x32xf32> to vector<8x32xf32>
    %26 = arith.mulf %23, %25 : vector<8x32xf32>
    %c0_14 = arith.constant 0 : index
    %c0_15 = arith.constant 0 : index
    %27 = vector.load %arg7[%c0_14, %c0_15] : memref<1x32xf32, #tpu.memory_space<vmem>>, vector<1x32xf32>
    %28 = vector.broadcast %27 : vector<1x32xf32> to vector<8x32xf32>
    %29 = arith.addf %26, %28 : vector<8x32xf32>
    %30 = vector.broadcast %6 : vector<8x1xi32> to vector<8x8xi32>
    %31 = vector.broadcast %7 : vector<1x8xi32> to vector<8x8xi32>
    %32 = arith.cmpi eq, %30, %31 : vector<8x8xi32>
    %c0_i32_16 = arith.constant 0 : i32
    %33 = vector.broadcast %c0_i32_16 : i32 to vector<8x1xi32>
    %34 = arith.cmpi eq, %6, %33 : vector<8x1xi32>
    %cst_17 = arith.constant 0.000000e+00 : f32
    %35 = vector.broadcast %cst_17 : f32 to vector<8x32xf32>
    %c0_18 = arith.constant 0 : index
    %c0_19 = arith.constant 0 : index
    %c0_20 = arith.constant 0 : index
    %36 = vector.load %arg8[%c0_18, %c0_19, %c0_20] : memref<4x32x8xf32, #tpu.memory_space<vmem>>, vector<1x32x8xf32>
    %37 = vector.shape_cast %36 : vector<1x32x8xf32> to vector<32x8xf32>
    %cst_21 = arith.constant dense<0.000000e+00> : vector<8x8xf32>
    %38 = tpu.matmul %29, %37, %cst_21 {dimension_numbers = #tpu.dot_dimension_numbers<[1], [0], [0], [1], [0, 0, 1, 1], [], []>} : vector<8x32xf32>, vector<32x8xf32>, vector<8x8xf32> -> vector<8x8xf32>
    %c0_22 = arith.constant 0 : index
    %c0_23 = arith.constant 0 : index
    %c0_24 = arith.constant 0 : index
    %39 = vector.load %arg13[%c0_22, %c0_23, %c0_24] : memref<4x8x8xf32, #tpu.memory_space<vmem>>, vector<1x8x8xf32>
    %40 = vector.shape_cast %39 : vector<1x8x8xf32> to vector<8x8xf32>
    %c0_25 = arith.constant 0 : index
    %c0_26 = arith.constant 0 : index
    %c0_27 = arith.constant 0 : index
    %41 = vector.load %arg14[%c0_25, %c0_26, %c0_27] : memref<4x8x8xf32, #tpu.memory_space<vmem>>, vector<1x8x8xf32>
    %42 = vector.shape_cast %41 : vector<1x8x8xf32> to vector<8x8xf32>
    %cst_28 = arith.constant dense<0.000000e+00> : vector<8x8xf32>
    %43 = tpu.matmul %38, %40, %cst_28 {dimension_numbers = #tpu.dot_dimension_numbers<[1], [1], [0], [0], [0, 0, 1, 0], [], []>} : vector<8x8xf32>, vector<8x8xf32>, vector<8x8xf32> -> vector<8x8xf32>
    %cst_29 = arith.constant -1.000000e+30 : f32
    %44 = vector.broadcast %cst_29 : f32 to vector<8x8xf32>
    %45 = arith.select %32, %43, %44 : vector<8x8xi1>, vector<8x8xf32>
    %cst_30 = arith.constant dense<0xFF800000> : vector<8xf32>
    %46 = vector.multi_reduction <maximumf>, %45, %cst_30 [1] : vector<8x8xf32> to vector<8xf32>
    %47 = vector.shape_cast %46 : vector<8xf32> to vector<8x1xf32>
    %48 = vector.broadcast %47 : vector<8x1xf32> to vector<8x8xf32>
    %49 = arith.subf %45, %48 : vector<8x8xf32>
    %50 = math.exp %49 : vector<8x8xf32>
    %cst_31 = arith.constant dense<0.000000e+00> : vector<8xf32>
    %51 = vector.multi_reduction <add>, %50, %cst_31 [1] : vector<8x8xf32> to vector<8xf32>
    %52 = vector.shape_cast %51 : vector<8xf32> to vector<8x1xf32>
    %53 = vector.broadcast %52 : vector<8x1xf32> to vector<8x8xf32>
    %54 = arith.divf %50, %53 : vector<8x8xf32>
    %cst_32 = arith.constant dense<0.000000e+00> : vector<8x8xf32>
    %55 = tpu.matmul %54, %42, %cst_32 {dimension_numbers = #tpu.dot_dimension_numbers<[1], [0], [0], [1], [0, 0, 1, 1], [], []>} : vector<8x8xf32>, vector<8x8xf32>, vector<8x8xf32> -> vector<8x8xf32>
    %c0_33 = arith.constant 0 : index
    %c0_34 = arith.constant 0 : index
    %c0_35 = arith.constant 0 : index
    %56 = vector.load %arg11[%c0_33, %c0_34, %c0_35] : memref<4x8x32xf32, #tpu.memory_space<vmem>>, vector<1x8x32xf32>
    %57 = vector.shape_cast %56 : vector<1x8x32xf32> to vector<8x32xf32>
    %cst_36 = arith.constant dense<0.000000e+00> : vector<8x32xf32>
    %58 = tpu.matmul %55, %57, %cst_36 {dimension_numbers = #tpu.dot_dimension_numbers<[1], [0], [0], [1], [0, 0, 1, 1], [], []>} : vector<8x8xf32>, vector<8x32xf32>, vector<8x32xf32> -> vector<8x32xf32>
    %59 = arith.addf %35, %58 : vector<8x32xf32>
    %c1 = arith.constant 1 : index
    %c0_37 = arith.constant 0 : index
    %c0_38 = arith.constant 0 : index
    %60 = vector.load %arg8[%c1, %c0_37, %c0_38] : memref<4x32x8xf32, #tpu.memory_space<vmem>>, vector<1x32x8xf32>
    %61 = vector.shape_cast %60 : vector<1x32x8xf32> to vector<32x8xf32>
    %cst_39 = arith.constant dense<0.000000e+00> : vector<8x8xf32>
    %62 = tpu.matmul %29, %61, %cst_39 {dimension_numbers = #tpu.dot_dimension_numbers<[1], [0], [0], [1], [0, 0, 1, 1], [], []>} : vector<8x32xf32>, vector<32x8xf32>, vector<8x8xf32> -> vector<8x8xf32>
    %c1_40 = arith.constant 1 : index
    %c0_41 = arith.constant 0 : index
    %c0_42 = arith.constant 0 : index
    %63 = vector.load %arg13[%c1_40, %c0_41, %c0_42] : memref<4x8x8xf32, #tpu.memory_space<vmem>>, vector<1x8x8xf32>
    %64 = vector.shape_cast %63 : vector<1x8x8xf32> to vector<8x8xf32>
    %c1_43 = arith.constant 1 : index
    %c0_44 = arith.constant 0 : index
    %c0_45 = arith.constant 0 : index
    %65 = vector.load %arg14[%c1_43, %c0_44, %c0_45] : memref<4x8x8xf32, #tpu.memory_space<vmem>>, vector<1x8x8xf32>
    %66 = vector.shape_cast %65 : vector<1x8x8xf32> to vector<8x8xf32>
    %cst_46 = arith.constant dense<0.000000e+00> : vector<8x8xf32>
    %67 = tpu.matmul %62, %64, %cst_46 {dimension_numbers = #tpu.dot_dimension_numbers<[1], [1], [0], [0], [0, 0, 1, 0], [], []>} : vector<8x8xf32>, vector<8x8xf32>, vector<8x8xf32> -> vector<8x8xf32>
    %cst_47 = arith.constant -1.000000e+30 : f32
    %68 = vector.broadcast %cst_47 : f32 to vector<8x8xf32>
    %69 = arith.select %32, %67, %68 : vector<8x8xi1>, vector<8x8xf32>
    %cst_48 = arith.constant dense<0xFF800000> : vector<8xf32>
    %70 = vector.multi_reduction <maximumf>, %69, %cst_48 [1] : vector<8x8xf32> to vector<8xf32>
    %71 = vector.shape_cast %70 : vector<8xf32> to vector<8x1xf32>
    %72 = vector.broadcast %71 : vector<8x1xf32> to vector<8x8xf32>
    %73 = arith.subf %69, %72 : vector<8x8xf32>
    %74 = math.exp %73 : vector<8x8xf32>
    %cst_49 = arith.constant dense<0.000000e+00> : vector<8xf32>
    %75 = vector.multi_reduction <add>, %74, %cst_49 [1] : vector<8x8xf32> to vector<8xf32>
    %76 = vector.shape_cast %75 : vector<8xf32> to vector<8x1xf32>
    %77 = vector.broadcast %76 : vector<8x1xf32> to vector<8x8xf32>
    %78 = arith.divf %74, %77 : vector<8x8xf32>
    %cst_50 = arith.constant dense<0.000000e+00> : vector<8x8xf32>
    %79 = tpu.matmul %78, %66, %cst_50 {dimension_numbers = #tpu.dot_dimension_numbers<[1], [0], [0], [1], [0, 0, 1, 1], [], []>} : vector<8x8xf32>, vector<8x8xf32>, vector<8x8xf32> -> vector<8x8xf32>
    %c1_51 = arith.constant 1 : index
    %c0_52 = arith.constant 0 : index
    %c0_53 = arith.constant 0 : index
    %80 = vector.load %arg11[%c1_51, %c0_52, %c0_53] : memref<4x8x32xf32, #tpu.memory_space<vmem>>, vector<1x8x32xf32>
    %81 = vector.shape_cast %80 : vector<1x8x32xf32> to vector<8x32xf32>
    %cst_54 = arith.constant dense<0.000000e+00> : vector<8x32xf32>
    %82 = tpu.matmul %79, %81, %cst_54 {dimension_numbers = #tpu.dot_dimension_numbers<[1], [0], [0], [1], [0, 0, 1, 1], [], []>} : vector<8x8xf32>, vector<8x32xf32>, vector<8x32xf32> -> vector<8x32xf32>
    %83 = arith.addf %59, %82 : vector<8x32xf32>
    %c2 = arith.constant 2 : index
    %c0_55 = arith.constant 0 : index
    %c0_56 = arith.constant 0 : index
    %84 = vector.load %arg8[%c2, %c0_55, %c0_56] : memref<4x32x8xf32, #tpu.memory_space<vmem>>, vector<1x32x8xf32>
    %85 = vector.shape_cast %84 : vector<1x32x8xf32> to vector<32x8xf32>
    %cst_57 = arith.constant dense<0.000000e+00> : vector<8x8xf32>
    %86 = tpu.matmul %29, %85, %cst_57 {dimension_numbers = #tpu.dot_dimension_numbers<[1], [0], [0], [1], [0, 0, 1, 1], [], []>} : vector<8x32xf32>, vector<32x8xf32>, vector<8x8xf32> -> vector<8x8xf32>
    %c2_58 = arith.constant 2 : index
    %c0_59 = arith.constant 0 : index
    %c0_60 = arith.constant 0 : index
    %87 = vector.load %arg13[%c2_58, %c0_59, %c0_60] : memref<4x8x8xf32, #tpu.memory_space<vmem>>, vector<1x8x8xf32>
    %88 = vector.shape_cast %87 : vector<1x8x8xf32> to vector<8x8xf32>
    %c2_61 = arith.constant 2 : index
    %c0_62 = arith.constant 0 : index
    %c0_63 = arith.constant 0 : index
    %89 = vector.load %arg14[%c2_61, %c0_62, %c0_63] : memref<4x8x8xf32, #tpu.memory_space<vmem>>, vector<1x8x8xf32>
    %90 = vector.shape_cast %89 : vector<1x8x8xf32> to vector<8x8xf32>
    %cst_64 = arith.constant dense<0.000000e+00> : vector<8x8xf32>
    %91 = tpu.matmul %86, %88, %cst_64 {dimension_numbers = #tpu.dot_dimension_numbers<[1], [1], [0], [0], [0, 0, 1, 0], [], []>} : vector<8x8xf32>, vector<8x8xf32>, vector<8x8xf32> -> vector<8x8xf32>
    %cst_65 = arith.constant -1.000000e+30 : f32
    %92 = vector.broadcast %cst_65 : f32 to vector<8x8xf32>
    %93 = arith.select %32, %91, %92 : vector<8x8xi1>, vector<8x8xf32>
    %cst_66 = arith.constant dense<0xFF800000> : vector<8xf32>
    %94 = vector.multi_reduction <maximumf>, %93, %cst_66 [1] : vector<8x8xf32> to vector<8xf32>
    %95 = vector.shape_cast %94 : vector<8xf32> to vector<8x1xf32>
    %96 = vector.broadcast %95 : vector<8x1xf32> to vector<8x8xf32>
    %97 = arith.subf %93, %96 : vector<8x8xf32>
    %98 = math.exp %97 : vector<8x8xf32>
    %cst_67 = arith.constant dense<0.000000e+00> : vector<8xf32>
    %99 = vector.multi_reduction <add>, %98, %cst_67 [1] : vector<8x8xf32> to vector<8xf32>
    %100 = vector.shape_cast %99 : vector<8xf32> to vector<8x1xf32>
    %101 = vector.broadcast %100 : vector<8x1xf32> to vector<8x8xf32>
    %102 = arith.divf %98, %101 : vector<8x8xf32>
    %cst_68 = arith.constant dense<0.000000e+00> : vector<8x8xf32>
    %103 = tpu.matmul %102, %90, %cst_68 {dimension_numbers = #tpu.dot_dimension_numbers<[1], [0], [0], [1], [0, 0, 1, 1], [], []>} : vector<8x8xf32>, vector<8x8xf32>, vector<8x8xf32> -> vector<8x8xf32>
    %c2_69 = arith.constant 2 : index
    %c0_70 = arith.constant 0 : index
    %c0_71 = arith.constant 0 : index
    %104 = vector.load %arg11[%c2_69, %c0_70, %c0_71] : memref<4x8x32xf32, #tpu.memory_space<vmem>>, vector<1x8x32xf32>
    %105 = vector.shape_cast %104 : vector<1x8x32xf32> to vector<8x32xf32>
    %cst_72 = arith.constant dense<0.000000e+00> : vector<8x32xf32>
    %106 = tpu.matmul %103, %105, %cst_72 {dimension_numbers = #tpu.dot_dimension_numbers<[1], [0], [0], [1], [0, 0, 1, 1], [], []>} : vector<8x8xf32>, vector<8x32xf32>, vector<8x32xf32> -> vector<8x32xf32>
    %107 = arith.addf %83, %106 : vector<8x32xf32>
    %c3 = arith.constant 3 : index
    %c0_73 = arith.constant 0 : index
    %c0_74 = arith.constant 0 : index
    %108 = vector.load %arg8[%c3, %c0_73, %c0_74] : memref<4x32x8xf32, #tpu.memory_space<vmem>>, vector<1x32x8xf32>
    %109 = vector.shape_cast %108 : vector<1x32x8xf32> to vector<32x8xf32>
    %cst_75 = arith.constant dense<0.000000e+00> : vector<8x8xf32>
    %110 = tpu.matmul %29, %109, %cst_75 {dimension_numbers = #tpu.dot_dimension_numbers<[1], [0], [0], [1], [0, 0, 1, 1], [], []>} : vector<8x32xf32>, vector<32x8xf32>, vector<8x8xf32> -> vector<8x8xf32>
    %c3_76 = arith.constant 3 : index
    %c0_77 = arith.constant 0 : index
    %c0_78 = arith.constant 0 : index
    %111 = vector.load %arg13[%c3_76, %c0_77, %c0_78] : memref<4x8x8xf32, #tpu.memory_space<vmem>>, vector<1x8x8xf32>
    %112 = vector.shape_cast %111 : vector<1x8x8xf32> to vector<8x8xf32>
    %c3_79 = arith.constant 3 : index
    %c0_80 = arith.constant 0 : index
    %c0_81 = arith.constant 0 : index
    %113 = vector.load %arg14[%c3_79, %c0_80, %c0_81] : memref<4x8x8xf32, #tpu.memory_space<vmem>>, vector<1x8x8xf32>
    %114 = vector.shape_cast %113 : vector<1x8x8xf32> to vector<8x8xf32>
    %cst_82 = arith.constant dense<0.000000e+00> : vector<8x8xf32>
    %115 = tpu.matmul %110, %112, %cst_82 {dimension_numbers = #tpu.dot_dimension_numbers<[1], [1], [0], [0], [0, 0, 1, 0], [], []>} : vector<8x8xf32>, vector<8x8xf32>, vector<8x8xf32> -> vector<8x8xf32>
    %cst_83 = arith.constant -1.000000e+30 : f32
    %116 = vector.broadcast %cst_83 : f32 to vector<8x8xf32>
    %117 = arith.select %32, %115, %116 : vector<8x8xi1>, vector<8x8xf32>
    %cst_84 = arith.constant dense<0xFF800000> : vector<8xf32>
    %118 = vector.multi_reduction <maximumf>, %117, %cst_84 [1] : vector<8x8xf32> to vector<8xf32>
    %119 = vector.shape_cast %118 : vector<8xf32> to vector<8x1xf32>
    %120 = vector.broadcast %119 : vector<8x1xf32> to vector<8x8xf32>
    %121 = arith.subf %117, %120 : vector<8x8xf32>
    %122 = math.exp %121 : vector<8x8xf32>
    %cst_85 = arith.constant dense<0.000000e+00> : vector<8xf32>
    %123 = vector.multi_reduction <add>, %122, %cst_85 [1] : vector<8x8xf32> to vector<8xf32>
    %124 = vector.shape_cast %123 : vector<8xf32> to vector<8x1xf32>
    %125 = vector.broadcast %124 : vector<8x1xf32> to vector<8x8xf32>
    %126 = arith.divf %122, %125 : vector<8x8xf32>
    %cst_86 = arith.constant dense<0.000000e+00> : vector<8x8xf32>
    %127 = tpu.matmul %126, %114, %cst_86 {dimension_numbers = #tpu.dot_dimension_numbers<[1], [0], [0], [1], [0, 0, 1, 1], [], []>} : vector<8x8xf32>, vector<8x8xf32>, vector<8x8xf32> -> vector<8x8xf32>
    %c3_87 = arith.constant 3 : index
    %c0_88 = arith.constant 0 : index
    %c0_89 = arith.constant 0 : index
    %128 = vector.load %arg11[%c3_87, %c0_88, %c0_89] : memref<4x8x32xf32, #tpu.memory_space<vmem>>, vector<1x8x32xf32>
    %129 = vector.shape_cast %128 : vector<1x8x32xf32> to vector<8x32xf32>
    %cst_90 = arith.constant dense<0.000000e+00> : vector<8x32xf32>
    %130 = tpu.matmul %127, %129, %cst_90 {dimension_numbers = #tpu.dot_dimension_numbers<[1], [0], [0], [1], [0, 0, 1, 1], [], []>} : vector<8x8xf32>, vector<8x32xf32>, vector<8x32xf32> -> vector<8x32xf32>
    %131 = arith.addf %107, %130 : vector<8x32xf32>
    %cst_91 = arith.constant 0.000000e+00 : f32
    %132 = vector.shape_cast %34 : vector<8x1xi1> to vector<8x1xi1>
    %133 = vector.broadcast %132 : vector<8x1xi1> to vector<8x32xi1>
    %134 = vector.broadcast %cst_91 : f32 to vector<8x32xf32>
    %135 = arith.select %133, %134, %131 : vector<8x32xi1>, vector<8x32xf32>
    %c0_92 = arith.constant 0 : index
    %c0_93 = arith.constant 0 : index
    %c0_94 = arith.constant 0 : index
    %136 = vector.load %arg12[%c0_92, %c0_93, %c0_94] : memref<1x8x32xf32, #tpu.memory_space<vmem>>, vector<1x8x32xf32>
    %137 = vector.shape_cast %136 : vector<1x8x32xf32> to vector<8x32xf32>
    %138 = vector.shape_cast %135 : vector<8x32xf32> to vector<1x8x32xf32>
    tpu.vector_store %arg12[%c0_92, %c0_93, %c0_94], %138 {strides = array<i32>} : memref<1x8x32xf32, #tpu.memory_space<vmem>>, vector<1x8x32xf32>,
    return
  }
  func.func @transform_0(%arg0: i32, %arg1: i32) -> (i32, i32, i32) {
    %c0_i32 = arith.constant 0 : i32
    %c0_i32_0 = arith.constant 0 : i32
    return %arg0, %arg1, %c0_i32 : i32, i32, i32
  }
  func.func @transform_1(%arg0: i32, %arg1: i32) -> (i32, i32, i32) {
    %c0_i32 = arith.constant 0 : i32
    %c0_i32_0 = arith.constant 0 : i32
    return %arg0, %arg1, %c0_i32 : i32, i32, i32
  }
  func.func @transform_2(%arg0: i32, %arg1: i32) -> (i32, i32) {
    %c0_i32 = arith.constant 0 : i32
    %c0_i32_0 = arith.constant 0 : i32
    %c0_i32_1 = arith.constant 0 : i32
    return %c0_i32, %c0_i32_0 : i32, i32
  }
  func.func @transform_3(%arg0: i32, %arg1: i32) -> (i32, i32, i32) {
    %c0_i32 = arith.constant 0 : i32
    %c0_i32_0 = arith.constant 0 : i32
    %c0_i32_1 = arith.constant 0 : i32
    return %arg0, %c0_i32, %c0_i32_0 : i32, i32, i32
  }
  func.func @transform_4(%arg0: i32, %arg1: i32) -> (i32, i32) {
    %c0_i32 = arith.constant 0 : i32
    %c0_i32_0 = arith.constant 0 : i32
    %c0_i32_1 = arith.constant 0 : i32
    return %c0_i32, %c0_i32_0 : i32, i32
  }
  func.func @transform_5(%arg0: i32, %arg1: i32) -> (i32, i32) {
    %c0_i32 = arith.constant 0 : i32
    %c0_i32_0 = arith.constant 0 : i32
    %c0_i32_1 = arith.constant 0 : i32
    return %c0_i32, %c0_i32_0 : i32, i32
  }
  func.func @transform_6(%arg0: i32, %arg1: i32) -> (i32, i32, i32) {
    %c0_i32 = arith.constant 0 : i32
    %c0_i32_0 = arith.constant 0 : i32
    %c0_i32_1 = arith.constant 0 : i32
    %c0_i32_2 = arith.constant 0 : i32
    return %c0_i32, %c0_i32_0, %c0_i32_1 : i32, i32, i32
  }
  func.func @transform_7(%arg0: i32, %arg1: i32) -> (i32, i32, i32) {
    %c0_i32 = arith.constant 0 : i32
    %c0_i32_0 = arith.constant 0 : i32
    %c0_i32_1 = arith.constant 0 : i32
    %c0_i32_2 = arith.constant 0 : i32
    return %c0_i32, %c0_i32_0, %c0_i32_1 : i32, i32, i32
  }
  func.func @transform_8(%arg0: i32, %arg1: i32) -> (i32, i32, i32) {
    %c0_i32 = arith.constant 0 : i32
    %c0_i32_0 = arith.constant 0 : i32
    %c0_i32_1 = arith.constant 0 : i32
    %c0_i32_2 = arith.constant 0 : i32
    return %c0_i32, %c0_i32_0, %c0_i32_1 : i32, i32, i32
  }
  func.func @transform_9(%arg0: i32, %arg1: i32) -> (i32, i32, i32) {
    %c0_i32 = arith.constant 0 : i32
    %c0_i32_0 = arith.constant 0 : i32
    %c0_i32_1 = arith.constant 0 : i32
    %c0_i32_2 = arith.constant 0 : i32
    return %c0_i32, %c0_i32_0, %c0_i32_1 : i32, i32, i32
  }
  func.func @transform_10(%arg0: i32, %arg1: i32) -> (i32, i32, i32) {
    %c0_i32 = arith.constant 0 : i32
    %c0_i32_0 = arith.constant 0 : i32
    return %arg0, %arg1, %c0_i32 : i32, i32, i32
  }
}

</mosaic_0001>

<bundles_post_ra>
// kernel: tpu_custom_call.1
= control target key start
LH: loop header
LB: loop body
LE: loop exit
PB: predicated region body
PF: predicated region fallthrough
CT: control target
= control target key end

     0   :  { %s3437_s0 = inlined_call_operand.vmem [shape: f32[2,8,32], index: 0, kind: input, shape index: {}]   ;;  %s3438_s1 = inlined_call_operand.vmem [shape: s32[2,8,1], index: 1, kind: input, shape index: {}]   ;;  %s3439_s2 = inlined_call_operand.vmem [shape: s32[1,8], index: 2, kind: input, shape index: {}]   ;;  %s3440_s3 = inlined_call_operand.vmem [shape: f32[2,8,16], index: 3, kind: input, shape index: {}]   ;;  %s3441_s4 = inlined_call_operand.vmem [shape: f32[1,32], index: 4, kind: input, shape index: {}]   ;;  %s3442_s5 = inlined_call_operand.vmem [shape: f32[1,32], index: 5, kind: input, shape index: {}]   ;;  %s3443_s6 = inlined_call_operand.vmem [shape: f32[4,32,8], index: 6, kind: input, shape index: {}]   ;;  %s3444_s7 = inlined_call_operand.vmem [shape: f32[4,16,8], index: 7, kind: input, shape index: {}]   ;;  %s3445_s8 = inlined_call_operand.vmem [shape: f32[4,16,8], index: 8, kind: input, shape index: {}]   ;;  %s3446_s9 = inlined_call_operand.vmem [shape: f32[4,8,32], index: 9, kind: input, shape index: {}]   ;;  %s3447_s10 = inlined_call_operand.hbm [shape: f32[2,8,32], index: 10, kind: output, shape index: {}]  }
   0x1   :  { %3448 = sst [smem:[#allocation7_spill]] %s3437_s0 }
   0x2   :  { %15 = vsyncpa [#allocation5], 0 }
   0x3   :  { %17 = vsyncpa [#allocation5 + $0x1], 0  ;;  %s3028_s13 = smov 0   ;;  %s3030_s14 = smov 0  }
   0x4   :  { %s3032_s15 = smov 0   ;;  %s3034_s16 = smov 0  }
   0x5   :  { %s3036_s17 = smov 0   ;;  %s3038_s18 = smov 0  }
   0x6 LB: > { %s2456_s19 = sadd.s32 4294967295, %s2966_s18   ;;  %s2457_s20 = sadd.s32 4294967294, %s2966_s18   ;;  %s2966_s18 = sphi %s3038_s18, %s23_s18   ;;  %s2962_s17 = sphi %s3036_s17, %s3456_s17   ;;  %s2958_s16 = sphi %s3034_s16, %s3455_s16   ;;  %s2954_s15 = sphi %s3032_s15, %s3454_s15   ;;  %s2950_s14 = sphi %s3030_s14, %s3453_s14   ;;  %s2946_s13 = sphi %s3028_s13, %s3452_s13  }
   0x7   : > { %s35_s21 = sadd.s32 1, %s2962_s17  ;;  %s273_s22 = sadd.s32 1, %s2954_s15 }
   0x8   : > { %p37_p0 = scmp.ge.s32.totalorder %s35_s21, 2  ;;  %p283_p1 = scmp.ne.s32.totalorder %s2954_s15, %s2950_s14 }
   0x9   : > { %p284_p2 = scmp.eq.s32.totalorder %s2456_s19, 1  ;;  %p289_p3 = scmp.ne.s32.totalorder %s2950_s14, %s2946_s13 }
   0xa   : > { %s3458_s21 = smov (%p37_p0, %s35_s21), 0  ;;  %p290_p5 = scmp.eq.s32.totalorder %s2457_s20, 1 }
   0xb   : > { %p3068_p4 = por %p284_p2, %p283_p1  ;;  %s268_s24 = ssub.s32 %s2962_s17, %s3458_s21 }
   0xc   : > { %p2460_p6 = scmp.ge.s32.totalorder %s2966_s18, 1  ;;  %p271_p7 = scmp.eq.s32.totalorder %s268_s24, 0 }
   0xd   : > { %p3075_p8 = por %p290_p5, %p289_p3  ;;  %p356_p9 = scmp.lt.s32.totalorder %s2966_s18, 3 }
   0xe   : > { %s3081_s26 = scalar_select %p271_p7, %s2954_s15, %s273_s22  }
   0xf   : > { %p357_p10 = pnand %p2460_p6, %p356_p9 }
  0x10   : > { %p407_p11 = scmp.lt.s32.totalorder (!%p357_p10), %s2958_s16, 1  ;;  %vm1034_vm0 = vcmask (!%p357_p10), 261120   ;;  %s3451_s0 = sld [smem:[#allocation7_spill]] (!%p357_p10)  ;;  %v2467_v7 = vld [vmem:[%s3444_s7 + $0x10] sm:$0xff] (!%p357_p10)  ;;  %v2468_v8 = vld [vmem:[%s3444_s7 + $0x18] sm:$0xff] (!%p357_p10)  ;;  %v2968_v10 = vmov (!%p357_p10), 0.0|0.0  }
  0x11   : > { %360 = sbr.rel (%p357_p10) target bundleno = 3549 (0xddd), region = 60  ;;  %v2762_v9 = vpack.c.bf16 (!%p357_p10), %v2468_v8, %v2467_v7  ;;  %2761 = vmatprep.subr.bf16.mxu0 (!%p357_p10), %v2968_v10  ;;  %2755 = vmatprep.subr.bf16.mxu1 (!%p357_p10), %v2968_v10  ;;  %v2473_v12 = vld [vmem:[%s3444_s7 + $0x20] sm:$0xff] (!%p357_p10)  ;;  %v2474_v13 = vld [vmem:[%s3444_s7 + $0x28] sm:$0xff] (!%p357_p10)  ;;  %vm2969_vm1 = vmmov (!%p357_p10), 0   ;;  %v2970_v17 = vmov (!%p357_p10), 0.0   ;;  %vm432_vm2 = vcmask (!%p357_p10), 130048  }
  0x12   : > { %v430_v14 = vld [vmem:[%s3444_s7] sm:$0xff] (!%p357_p10)  ;;  %v431_v15 = vld [vmem:[%s3444_s7 + $0x8] sm:$0xff] (!%p357_p10)  ;;  %v2768_v16 = vpack.c.bf16 (!%p357_p10), %v2474_v13, %v2473_v12  ;;  %2613 = vmatprep.mubr.msk.f32.mxu0 (!%p357_p10), %vm2969_vm1, %v2970_v17  ;;  %2599 = vmatprep.mubr.msk.f32.mxu1 (!%p357_p10), %vm2969_vm1, %v2970_v17  ;;  %v2479_v19 = vld [vmem:[%s3444_s7 + $0x30] sm:$0xff] (!%p357_p10)  ;;  %vm506_vm3 = vcmask (!%p357_p10), 64512   ;;  %s2524_s30 = sshll.u32 (!%p357_p10), %s2958_s16, 7  ;;  %s2972_s22 = smov (!%p357_p10), [#allocation4]  }
  0x13   : > { %2763 = vmatpush3.bf16.msra.mxu0 (!%p357_p10), %v2762_v9  ;;  %v2756_v18 = vpack.c.bf16 (!%p357_p10), %v431_v15, %v430_v14  ;;  %v2480_v20 = vld [vmem:[%s3444_s7 + $0x38] sm:$0xff] (!%p357_p10)  ;;  %v1074_v22 = vld [vmem:[%s3443_s6] sm:$0xff] (!%p357_p10)  ;;  %v1075_v23 = vld [vmem:[%s3443_s6 + $0x8] sm:$0xff] (!%p357_p10)  ;;  %s2892_s24 = sshll.u32 (!%p357_p10), %s2972_s22, 4  ;;  %s2893_s24 = int_to_ptr.vmem [resolvable:$false] %s2892_s24 }
  0x14   : > { %2767 = vmatprep.subr.bf16.mxu0 (!%p357_p10), %v2968_v10  ;;  %v2774_v21 = vpack.c.bf16 (!%p357_p10), %v2480_v20, %v2479_v19  ;;  %v2780_v24 = vpack.c.bf16 (!%p357_p10), %v1075_v23, %v1074_v22  ;;  %v1076_v25 = vld [vmem:[%s3443_s6 + $0x10] sm:$0xff] (!%p357_p10)  ;;  %v1077_v26 = vld [vmem:[%s3443_s6 + $0x18] sm:$0xff] (!%p357_p10)  ;;  %v508_v28 = vld [vmem:[%s3445_s8] sm:$0xff] (!%p357_p10) }
  0x15   : > { %2757 = vmatpush3.bf16.msra.mxu1 (!%p357_p10), %v2756_v18  ;;  %v2783_v27 = vpack.c.bf16 (!%p357_p10), %v1077_v26, %v1076_v25  ;;  %v509_v29 = vld [vmem:[%s3445_s8 + $0x8] sm:$0xff] (!%p357_p10)  ;;  %v2470_v30 = vld [vmem:[%s3445_s8 + $0x10] sm:$0xff] (!%p357_p10)  ;;  %v2471_v32 = vld [vmem:[%s3445_s8 + $0x18] sm:$0xff] (!%p357_p10) }
  0x16   : > { %2758 = vmatprep.subr.bf16.mxu1 (!%p357_p10), %v2968_v10  ;;  %v2759_v31 = vpack.c.bf16 (!%p357_p10), %v509_v29, %v508_v28  ;;  %v2765_v33 = vpack.c.bf16 (!%p357_p10), %v2471_v32, %v2470_v30  ;;  %v2476_v34 = vld [vmem:[%s3445_s8 + $0x20] sm:$0xff] (!%p357_p10)  ;;  %v2477_v35 = vld [vmem:[%s3445_s8 + $0x28] sm:$0xff] (!%p357_p10)  ;;  %v2482_v37 = vld [vmem:[%s3445_s8 + $0x30] sm:$0xff] (!%p357_p10) }
  0x17   : > { %v2771_v36 = vpack.c.bf16 (!%p357_p10), %v2477_v35, %v2476_v34  ;;  %v2483_v38 = vld [vmem:[%s3445_s8 + $0x38] sm:$0xff] (!%p357_p10)  ;;  %v2485_v44 = vld [vmem:[%s3441_s4] ss:$0 sm:$0xff] (!%p357_p10)  ;;  %v2493_v47 = vld [vmem:[%s3443_s6 + $0x28] sm:$0xff] (!%p357_p10) }
  0x18   : > { %s408_s27 = scalar_select %p407_p11, %s2958_s16, 1  ;;  %v2777_v39 = vpack.c.bf16 %v2483_v38, %v2482_v37  ;;  %v2492_v46 = vld [vmem:[%s3443_s6 + $0x20] sm:$0xff]  ;;  %v2494_v52 = vld [vmem:[%s3443_s6 + $0x30] sm:$0xff]  ;;  %v2495_v53 = vld [vmem:[%s3443_s6 + $0x38] sm:$0xff] }
  0x19   : > { %v2486_v48 = vld [vmem:[%s3442_s5] ss:$0 sm:$0xff]  ;;  %v2786_v50 = vpack.c.bf16 %v2493_v47, %v2492_v46  ;;  %v2789_v54 = vpack.c.bf16 %v2495_v53, %v2494_v52  ;;  %v2504_v47 = vld [vmem:[%s3443_s6 + $0x48] sm:$0xff]  ;;  %v2505_v52 = vld [vmem:[%s3443_s6 + $0x50] sm:$0xff] }
  0x1a   : > { %s3085_s28 = sshll.u32 %s408_s27, 3  ;;  %v2503_v46 = vld [vmem:[%s3443_s6 + $0x40] sm:$0xff]  ;;  %v2506_v53 = vld [vmem:[%s3443_s6 + $0x58] sm:$0xff]  ;;  %s404_s27 = sand.u32 1, %s2950_s14  }
  0x1b   : > { %s413_s11 = scalar_lea.vmem %s3451_s0, %s3085_s28  ;;  %s424_s29 = scalar_lea.vmem %s3440_s3, %s3085_s28 }
  0x1c   : > { %v1031_v0 = vld [vmem:[%s413_s11] sm:$0xff]  ;;  %s420_s19 = scalar_lea.vmem %s3438_s1, %s3085_s28  ;;  %s3389_s28 = scalar_lea.hbm %s3447_s10, %s2524_s30 }
  0x1d   : > { %v1035_v1 = vsel %vm1034_vm0, %v1031_v0, 0.0  ;;  %v3109_v11 = vld [vmem:[%s424_s29] sm:$0xff]  ;;  %s2461_s29 = sshll.u32 %s404_s27, 3  ;;  %s2344_s20 = scalar_lea.sflag [#allocation5], %s404_s27 }
  0x1e   : > { %1036 = vadd.xlane.f32.xlu0 %v1035_v1  ;;  %2614 = vmatmul.mubr.msk.f32.vlgmr.msra.gmra.mrb[0].mxu0 %vm432_vm2, %v3109_v11  ;;  %v3253_v1 = vld [vmem:[%s420_s19] sm:$0xff]  ;;  %s406_s11 = scalar_lea.vmem [#allocation4], %s2461_s29  ;;  %s2894_s29 = scalar_lea.vmem %s2893_s24, 256 }
  0x1f   : > { %2769 = vmatpush3.bf16.msra.mxu0 %v2768_v16  ;;  %2627 = vmatprep.mubr.msk.f32.mxu0 %vm2969_vm1, %v2970_v17  ;;  %v3268_v16 = vld [vmem:[%s3439_s2] ss:$0 sm:$0xff]  ;;  %vm1073_vm5 = vcmp.eq.s32.totalorder %v3253_v1, 0  ;;  %s2358_s0 = sshll.u32 %s406_s11, 4  ;;  %s3391_s0 = int_to_ptr.vmem [resolvable:$true] %s2358_s0 }
  0x20   : > { %2773 = vmatprep.subr.bf16.mxu0 %v2968_v10  ;;  %2600 = vmatmul.mubr.msk.f32.vlgmr.msra.gmra.mrb[0].mxu1 %vm432_vm2, %v3109_v11  ;;  %s2888_s16 = scalar_lea.vmem %s3391_s0, 128  ;;  %p2895_p1 = scmp.lt.s32.totalorder %s3391_s0, %s2893_s24 }
  0x21   : > { %2606 = vmatprep.mubr.msk.f32.mxu1 %vm2969_vm1, %v2970_v17  ;;  %2760 = vmatpush3.bf16.msra.mxu1 %v2759_v31  ;;  %p2889_p12 = scmp.ne.s32.totalorder %s3391_s0, %s2888_s16  ;;  %p2896_p2 = scmp.lt.s32.totalorder %s2894_s29, %s2888_s16 }
  0x22   : > { %2628 = vmatmul.mubr.msk.f32.vlgmr.msra.gmra.mrb[2].mxu0 %vm432_vm2, %v3109_v11  ;;  %2764 = vmatprep.subr.bf16.mxu1 %v2968_v10 }
  0x23   : > { %2775 = vmatpush3.bf16.msra.mxu0 %v2774_v21  ;;  %2641 = vmatprep.mubr.msk.f32.mxu0 %vm2969_vm1, %v2970_v17  ;;  %p2890_p13 = pnand %p2889_p12, %p3068_p4  ;;  %p2897_p3 = por %p2896_p2, %p2895_p1 }
  0x24   : > { %2779 = vmatprep.subr.bf16.mxu0 %v2968_v10  ;;  %2607 = vmatmul.mubr.msk.f32.vlgmr.msra.gmra.mrb[2].mxu1 %vm432_vm2, %v3109_v11 }
  0x25   : > { %2766 = vmatpush3.bf16.msra.mxu1 %v2765_v33  ;;  %2620 = vmatprep.mubr.msk.f32.mxu1 %vm2969_vm1, %v2970_v17  ;;  %p2891_p0 = pneg %p2890_p13 }
  0x26   : > { %2642 = vmatmul.mubr.msk.f32.vlgmr.msra.gmra.mrb[4].mxu0 %vm432_vm2, %v3109_v11  ;;  %2770 = vmatprep.subr.bf16.mxu1 %v2968_v10 }
  0x27   : > { %2781 = vmatpush3.bf16.msra.mxu0 %v2780_v24  ;;  %2659 = vmatprep.mubr.msk.f32.mxu0 %vm2969_vm1, %v2970_v17  ;;  %p2898_p5 = pnand %p2897_p3, %p2891_p0 }
  0x28   : > { %2782 = vmatprep.subr.bf16.mxu0 %v2968_v10  ;;  %2621 = vmatmul.mubr.msk.f32.vlgmr.msra.gmra.mrb[4].mxu1 %vm432_vm2, %v3109_v11 }
  0x29   : > { %2634 = vmatprep.mubr.msk.f32.mxu1 %vm2969_vm1, %v2970_v17  ;;  %2772 = vmatpush3.bf16.msra.mxu1 %v2771_v36 }
  0x2a   : > { %2776 = vmatprep.subr.bf16.mxu1 %v2968_v10 }
  0x2b   : > { %2784 = vmatpush3.bf16.msra.mxu0 %v2783_v27 }
  0x2c   : > { %2785 = vmatprep.subr.bf16.mxu0 %v2968_v10  ;;  %2635 = vmatmul.mubr.msk.f32.vlgmr.msra.gmra.mrb[6].mxu1 %vm432_vm2, %v3109_v11 }
  0x2d   : > { %2778 = vmatpush3.bf16.msra.mxu1 %v2777_v39  ;;  %2648 = vmatprep.mubr.msk.f32.mxu1 %vm2969_vm1, %v2970_v17 }
  0x2e   : > { %2662 = vmatprep.subr.mxu1 %v2970_v17 }
  0x30   : > { %2649 = vmatmul.mubr.msk.f32.vlgmr.msra.gmra.mrb[8].mxu1 %vm432_vm2, %v3109_v11 }
  0x31   : > { %2664 = vmatprep.mubr.msk.f32.mxu1 %vm2969_vm1, %v2970_v17 }
  0xab   : > { %v1037_v2 = vpop.xlane.xlu0 %1036 }
  0xac   : > { %v1039_v3 = vmul.f32 0.03125, %v1037_v2 }
  0xae   : > { %v3092_v4 = vsub.f32 %v1031_v0, %v1039_v3  ;;  %v2971_v0 = vmov 0  }
  0xaf   : > { %2868 = vset.pattern.permute.xlu1 %v2971_v0  ;;  %2869 = vset.pattern.permute.xlu0 %v2971_v0 }
  0xb0   : > { %v1041_v5 = vmul.f32 %v3092_v4, %v3092_v4  ;;  %1066 = vperm.xlu1 %2868, %v3253_v1  }
  0xb2   : > { %v1042_v6 = vsel %vm1034_vm0, %v1041_v5, 0.0 }
  0xb3   : > { %1043 = vadd.xlane.f32.xlu0 %v1042_v6 }
  0xf1   : > { %v650_v55 = vpop.f32.mrb[0].mxu0 }
  0xf2   : > { %655 = vst.msk [vmem:[#allocation2 + $0x8] sm:$0xff] %vm506_vm3, %v650_v55  ;;  %v2615_v56 = vpop.f32.mrb[1].mxu0 }
  0xf3   : > { %v502_v57 = vpop.f32.mrb[0].mxu1  ;;  %v1315_v56 = vld [vmem:[%s3446_s9] sm:$0xff] }
  0xf4   : > { %507 = vst.msk [vmem:[#allocation2] sm:$0xff] %vm506_vm3, %v502_v57  ;;  %v2601_v59 = vpop.f32.mrb[1].mxu1 }
  0xf5   : > { %v800_v58 = vpop.f32.mrb[2].mxu0 }
  0xf6   : > { %805 = vst.msk [vmem:[#allocation2 + $0x10] sm:$0xff] %vm506_vm3, %v800_v58  ;;  %v2629_v60 = vpop.f32.mrb[3].mxu0 }
  0xf7   : > { %v576_v2 = vpop.f32.mrb[2].mxu1 }
  0xf8   : > { %580 = vst.msk [vmem:[#allocation3] sm:$0xff] %vm506_vm3, %v576_v2  ;;  %v2608_v3 = vpop.f32.mrb[3].mxu1 }
  0xf9   : > { %v950_v61 = vpop.f32.mrb[4].mxu0  ;;  %v1392_v31 = vld [vmem:[#allocation2 + $0x8] sm:$0xff] }
  0xfa   : > { %955 = vst.msk [vmem:[#allocation2 + $0x18] sm:$0xff] %vm506_vm3, %v950_v61  ;;  %v2643_v62 = vpop.f32.mrb[5].mxu0 }
  0xfb   : > { %v1151_v63 = vld [vmem:[#allocation2] sm:$0xff] }
  0xfc   : > { %2663 = vmatpush3.xpose.msk.msra.mxu1 %vm506_vm3, %v1151_v63 }
  0xfd   : > { %2667 = vmatprep.subr.mxu1 %v2970_v17  ;;  %v1780_v61 = vld [vmem:[#allocation2 + $0x10] sm:$0xff] }
  0xff   : > { %v1152_v11 = vld [vmem:[#allocation3] sm:$0xff] }
 0x12f   : > { %v3270_v18 = vpop.permute.xlu1 %1066 }
 0x130   : > { %vm1072_vm4 = vcmp.eq.s32.totalorder %v3270_v18, %v3268_v16  ;;  %v2521_v16 = vld [vmem:[%s3446_s9 + $0x18] sm:$0xff]  ;;  %v2336_v18 = vsel %vm1073_vm5, 1, %v2971_v0 }
 0x140   : > { %v1044_v40 = vpop.xlane.xlu0 %1043 }
 0x141   : > { %v1045_v41 = vmul.f32 0.03125, %v1044_v40 }
 0x143   : > { %v1046_v42 = vadd.f32 1e-05, %v1045_v41 }
 0x145   : > { %2870 = vrsqrt.f32 %v1046_v42 }
 0x14f   : > { %v2871_v43 = vpop.eup %2870 }
 0x150   : > { %v1048_v45 = vmul.f32 %v2871_v43, %v3092_v4  ;;  %v725_v4 = vpop.f32.mrb[4].mxu1 }
 0x151   : > { %730 = vst.msk [vmem:[#allocation3 + $0x8] sm:$0xff] %vm506_vm3, %v725_v4  ;;  %v2622_v5 = vpop.f32.mrb[5].mxu1 }
 0x152   : > { %v1056_v49 = vmul.f32 %v2485_v44, %v1048_v45  ;;  %v875_v6 = vpop.f32.mrb[6].mxu1  ;;  %v2500_v44 = vld [vmem:[%s3446_s9 + $0x8] sm:$0xff] }
 0x153   : > { %880 = vst.msk [vmem:[#allocation3 + $0x10] sm:$0xff] %vm506_vm3, %v875_v6  ;;  %v2636_v7 = vpop.f32.mrb[7].mxu1 }
 0x154   : > { %v3224_v51 = vadd.f32 %v2486_v48, %v1056_v49  ;;  %v1025_v8 = vpop.f32.mrb[8].mxu1  ;;  %v2792_v49 = vpack.c.bf16 %v2504_v47, %v2503_v46 }
 0x155   : > { %1030 = vst.msk [vmem:[#allocation3 + $0x18] sm:$0xff] %vm506_vm3, %v1025_v8  ;;  %v2650_v9 = vpop.f32.mrb[9].mxu1 }
 0x156   : > { %2660 = vmatmul.mubr.msk.f32.vlgmr.msra.gmra.mrb[6].mxu0 %vm1034_vm0, %v3224_v51  ;;  %v2511_v9 = vld [vmem:[%s3446_s9 + $0x10] sm:$0xff] }
 0x157   : > { %2787 = vmatpush3.bf16.msra.mxu0 %v2786_v50  ;;  %2680 = vmatprep.mubr.msk.f32.mxu0 %vm2969_vm1, %v2970_v17 }
 0x158   : > { %2788 = vmatprep.subr.bf16.mxu0 %v2968_v10  ;;  %v1394_v32 = vld [vmem:[#allocation3 + $0x8] sm:$0xff] }
 0x15a   : > { %v1782_v55 = vld [vmem:[#allocation3 + $0x10] sm:$0xff] }
 0x15b   : > { %2790 = vmatpush3.bf16.msra.mxu0 %v2789_v54  ;;  %v2795_v54 = vpack.c.bf16 %v2506_v53, %v2505_v52 }
 0x15c   : > { %2693 = vmatprep.subr.mxu0 %v2970_v17 }
 0x15e   : > { %2681 = vmatmul.mubr.msk.f32.vlgmr.msra.gmra.mrb[8].mxu0 %vm1034_vm0, %v3224_v51 }
 0x15f   : > { %2695 = vmatprep.mubr.msk.f32.mxu0 %vm2969_vm1, %v2970_v17  ;;  %2694 = vmatpush3.msra.mxu0 %v2500_v44 }
 0x160   : > { %2698 = vmatprep.subr.mxu0 %v2970_v17 }
 0x229   : > { %v1147_v12 = vpop.f32.mrb[6].mxu0 }
 0x22a   : > { %v2661_v13 = vpop.f32.mrb[7].mxu0  ;;  %2665 = vmatmul.mubr.msk.f32.vlgmr.msra.gmra.mrb[10].mxu1 %vm506_vm3, %v1147_v12  ;;  %v2513_v12 = vld [vmem:[%s3443_s6 + $0x60] sm:$0xff] }
 0x22b   : > { %2668 = vmatpush3.msra.mxu1 %v1152_v11  ;;  %2669 = vmatprep.mubr.msk.f32.mxu1 %vm2969_vm1, %v2970_v17  ;;  %v2514_v13 = vld [vmem:[%s3443_s6 + $0x68] sm:$0xff] }
 0x22c   : > { %2683 = vmatprep.subr.mxu1 %v2970_v17 }
 0x231   : > { %v1387_v14 = vpop.f32.mrb[8].mxu0 }
 0x232   : > { %v2682_v15 = vpop.f32.mrb[9].mxu0 }
 0x233   : > { %v2798_v15 = vpack.c.bf16 %v2514_v13, %v2513_v12 }
 0x2fd   : > { %v1226_v19 = vpop.f32.mrb[10].mxu1 }
 0x2fe   : > { %v1230_v20 = vsel %vm1072_vm4, %v1226_v19, -1e+30  ;;  %v2666_v21 = vpop.f32.mrb[11].mxu1 }
 0x2ff   : > { %v1231_v22 = vsel %vm506_vm3, %v1230_v20, -inf  ;;  %v2516_v21 = vld [vmem:[%s3443_s6 + $0x78] sm:$0xff] }
 0x300   : > { %1232 = vmax.xlane.f32.xlu1 %v1231_v22 }
 0x38d   : > { %v1233_v23 = vpop.xlane.xlu1 %1232 }
 0x38e   : > { %v1234_v24 = vsub.f32 %v1230_v20, %v1233_v23  ;;  %v2515_v20 = vld [vmem:[%s3443_s6 + $0x70] sm:$0xff] }
 0x38f   : > { %v2801_v22 = vpack.c.bf16 %v2516_v21, %v2515_v20 }
 0x390   : > { %v1235_v25 = vmul.f32 1.442695, %v1234_v24 }
 0x392   : > { %2872 = vpow2.f32 %v1235_v25  ;;  %v2096_v25 = vld [vmem:[#allocation2 + $0x18] sm:$0xff] }
 0x39c   : > { %v2873_v26 = vpop.eup %2872 }
 0x39d   : > { %v1237_v27 = vsel %vm506_vm3, %v2873_v26, 0.0 }
 0x39e   : > { %1238 = vadd.xlane.f32.xlu0 %v1237_v27 }
 0x42b   : > { %v1239_v28 = vpop.xlane.xlu0 %1238 }
 0x42c   : > { %2874 = vrcp.f32 %v1239_v28 }
 0x436   : > { %v2875_v29 = vpop.eup %2874 }
 0x437   : > { %v1241_v30 = vmul.f32 %v2875_v29, %v2873_v26 }
 0x439   : > { %2670 = vmatmul.mubr.msk.f32.vlgmr.msra.gmra.mrb[12].mxu1 %vm506_vm3, %v1241_v30 }
 0x43a   : > { %2684 = vmatpush3.xpose.msk.msra.mxu1 %vm506_vm3, %v1392_v31  ;;  %2685 = vmatprep.mubr.msk.f32.mxu1 %vm2969_vm1, %v2970_v17 }
 0x43b   : > { %2688 = vmatprep.subr.mxu1 %v2970_v17 }
 0x43d   : > { %2686 = vmatmul.mubr.msk.f32.vlgmr.msra.gmra.mrb[14].mxu1 %vm506_vm3, %v1387_v14 }
 0x43e   : > { %2689 = vmatpush3.msra.mxu1 %v1394_v32  ;;  %2690 = vmatprep.mubr.msk.f32.mxu1 %vm2969_vm1, %v2970_v17 }
 0x43f   : > { %2791 = vmatprep.subr.bf16.mxu1 %v2968_v10 }
 0x50c   : > { %v1311_v33 = vpop.f32.mrb[12].mxu1 }
 0x50d   : > { %v2671_v34 = vpop.f32.mrb[13].mxu1 }
 0x510   : > { %v1467_v35 = vpop.f32.mrb[14].mxu1 }
 0x511   : > { %v1471_v36 = vsel %vm1072_vm4, %v1467_v35, -1e+30  ;;  %v2687_v37 = vpop.f32.mrb[15].mxu1 }
 0x512   : > { %v1472_v38 = vsel %vm506_vm3, %v1471_v36, -inf }
 0x513   : > { %1473 = vmax.xlane.f32.xlu0 %v1472_v38 }
 0x5a0   : > { %v1474_v39 = vpop.xlane.xlu0 %1473 }
 0x5a1   : > { %v1475_v40 = vsub.f32 %v1471_v36, %v1474_v39 }
 0x5a3   : > { %v1476_v41 = vmul.f32 1.442695, %v1475_v40 }
 0x5a5   : > { %2876 = vpow2.f32 %v1476_v41 }
 0x5af   : > { %v2877_v42 = vpop.eup %2876 }
 0x5b0   : > { %v1478_v43 = vsel %vm506_vm3, %v2877_v42, 0.0 }
 0x5b1   : > { %1479 = vadd.xlane.f32.xlu0 %v1478_v43 }
 0x63e   : > { %v1480_v45 = vpop.xlane.xlu0 %1479 }
 0x63f   : > { %2878 = vrcp.f32 %v1480_v45 }
 0x649   : > { %v2879_v48 = vpop.eup %2878 }
 0x64a   : > { %v1482_v50 = vmul.f32 %v2879_v48, %v2877_v42 }
 0x64c   : > { %2691 = vmatmul.mubr.msk.f32.vlgmr.msra.gmra.mrb[16].mxu1 %vm506_vm3, %v1482_v50 }
 0x64d   : > { %2793 = vmatpush3.bf16.msra.mxu1 %v2792_v49  ;;  %2711 = vmatprep.mubr.msk.f32.mxu1 %vm2969_vm1, %v2970_v17 }
 0x64e   : > { %2794 = vmatprep.subr.bf16.mxu1 %v2968_v10 }
 0x651   : > { %2796 = vmatpush3.bf16.msra.mxu1 %v2795_v54 }
 0x652   : > { %2719 = vmatprep.subr.mxu1 %v2970_v17 }
 0x654   : > { %2712 = vmatmul.mubr.msk.f32.vlgmr.msra.gmra.mrb[18].mxu1 %vm1034_vm0, %v3224_v51 }
 0x655   : > { %2720 = vmatpush3.msra.mxu1 %v1782_v55  ;;  %2721 = vmatprep.mubr.msk.f32.mxu1 %vm2969_vm1, %v2970_v17 }
 0x656   : > { %2797 = vmatprep.subr.bf16.mxu1 %v2968_v10 }
 0x71f   : > { %v1552_v57 = vpop.f32.mrb[16].mxu1 }
 0x720   : > { %v2692_v58 = vpop.f32.mrb[17].mxu1  ;;  %2696 = vmatmul.mubr.msk.f32.vlgmr.msra.gmra.mrb[10].mxu0 %vm506_vm3, %v1552_v57 }
 0x721   : > { %2699 = vmatpush3.msra.mxu0 %v1315_v56  ;;  %2700 = vmatprep.mubr.msk.f32.mxu0 %vm2969_vm1, %v2970_v17 }
 0x722   : > { %2714 = vmatprep.subr.mxu0 %v2970_v17 }
 0x727   : > { %v1775_v59 = vpop.f32.mrb[18].mxu1 }
 0x728   : > { %v2713_v60 = vpop.f32.mrb[19].mxu1  ;;  %2701 = vmatmul.mubr.msk.f32.vlgmr.msra.gmra.mrb[10].mxu0 %vm506_vm3, %v1311_v33 }
 0x729   : > { %2715 = vmatpush3.xpose.msk.msra.mxu0 %vm506_vm3, %v1780_v61  ;;  %2716 = vmatprep.mubr.msk.f32.mxu0 %vm2969_vm1, %v2970_v17 }
 0x72a   : > { %2724 = vmatprep.subr.mxu0 %v2970_v17 }
 0x72c   : > { %2717 = vmatmul.mubr.msk.f32.vlgmr.msra.gmra.mrb[12].mxu0 %vm506_vm3, %v1775_v59 }
 0x72d   : > { %2726 = vmatprep.mubr.msk.f32.mxu0 %vm2969_vm1, %v2970_v17  ;;  %2725 = vmatpush3.msra.mxu0 %v2511_v9 }
 0x72e   : > { %2740 = vmatprep.subr.mxu0 %v2970_v17 }
 0x7ff   : > { %v1855_v62 = vpop.f32.mrb[12].mxu0 }
 0x800   : > { %v1859_v63 = vsel %vm1072_vm4, %v1855_v62, -1e+30  ;;  %v2718_v2 = vpop.f32.mrb[13].mxu0 }
 0x801   : > { %v1860_v3 = vsel %vm506_vm3, %v1859_v63, -inf }
 0x802   : > { %1861 = vmax.xlane.f32.xlu0 %v1860_v3 }
 0x88f   : > { %v1862_v4 = vpop.xlane.xlu0 %1861 }
 0x890   : > { %v1863_v5 = vsub.f32 %v1859_v63, %v1862_v4 }
 0x892   : > { %v1864_v6 = vmul.f32 1.442695, %v1863_v5 }
 0x894   : > { %2880 = vpow2.f32 %v1864_v6 }
 0x89e   : > { %v2881_v7 = vpop.eup %2880 }
 0x89f   : > { %v1866_v8 = vsel %vm506_vm3, %v2881_v7, 0.0 }
 0x8a0   : > { %1867 = vadd.xlane.f32.xlu0 %v1866_v8 }
 0x92d   : > { %v1868_v11 = vpop.xlane.xlu0 %1867 }
 0x92e   : > { %2882 = vrcp.f32 %v1868_v11 }
 0x938   : > { %v2883_v14 = vpop.eup %2882 }
 0x939   : > { %v1870_v19 = vmul.f32 %v2883_v14, %v2881_v7 }
 0x93b   : > { %2722 = vmatmul.mubr.msk.f32.vlgmr.msra.gmra.mrb[20].mxu1 %vm506_vm3, %v1870_v19 }
 0x93c   : > { %2799 = vmatpush3.bf16.msra.mxu1 %v2798_v15  ;;  %2737 = vmatprep.mubr.msk.f32.mxu1 %vm2969_vm1, %v2970_v17 }
 0x93d   : > { %2800 = vmatprep.subr.bf16.mxu1 %v2968_v10  ;;  %v2098_v10 = vld [vmem:[#allocation3 + $0x18] sm:$0xff] }
 0x940   : > { %2802 = vmatpush3.bf16.msra.mxu1 %v2801_v22 }
 0x943   : > { %2738 = vmatmul.mubr.msk.f32.vlgmr.msra.gmra.mrb[22].mxu1 %vm1034_vm0, %v3224_v51 }
 0xa0e   : > { %v1940_v23 = vpop.f32.mrb[20].mxu1 }
 0xa0f   : > { %v2723_v24 = vpop.f32.mrb[21].mxu1  ;;  %2727 = vmatmul.mubr.msk.f32.vlgmr.msra.gmra.mrb[10].mxu0 %vm506_vm3, %v1940_v23 }
 0xa10   : > { %2741 = vmatpush3.xpose.msk.msra.mxu0 %vm506_vm3, %v2096_v25  ;;  %2742 = vmatprep.mubr.msk.f32.mxu0 %vm2969_vm1, %v2970_v17 }
 0xa11   : > { %2745 = vmatprep.subr.mxu0 %v2970_v17 }
 0xa16   : > { %v2091_v26 = vpop.f32.mrb[22].mxu1 }
 0xa17   : > { %v2739_v27 = vpop.f32.mrb[23].mxu1  ;;  %2743 = vmatmul.mubr.msk.f32.vlgmr.msra.gmra.mrb[14].mxu0 %vm506_vm3, %v2091_v26 }
 0xa18   : > { %2746 = vmatpush3.msra.mxu0 %v2098_v10  ;;  %2747 = vmatprep.mubr.msk.f32.mxu0 %vm2969_vm1, %v2970_v17 }
 0xa19   : > { %2750 = vmatprep.subr.mxu0 %v2970_v17 }
 0xaea   : > { %v2171_v51 = vpop.f32.mrb[14].mxu0 }
 0xaeb   : > { %v2175_v28 = vsel %vm1072_vm4, %v2171_v51, -1e+30  ;;  %v2744_v29 = vpop.f32.mrb[15].mxu0 }
 0xaec   : > { %v2176_v30 = vsel %vm506_vm3, %v2175_v28, -inf }
 0xaed   : > { %2177 = vmax.xlane.f32.xlu0 %v2176_v30 }
 0xb7a   : > { %v2178_v31 = vpop.xlane.xlu0 %2177 }
 0xb7b   : > { %v2179_v32 = vsub.f32 %v2175_v28, %v2178_v31 }
 0xb7d   : > { %v2180_v33 = vmul.f32 1.442695, %v2179_v32 }
 0xb7f   : > { %2884 = vpow2.f32 %v2180_v33 }
 0xb89   : > { %v2885_v34 = vpop.eup %2884 }
 0xb8a   : > { %v2182_v35 = vsel %vm506_vm3, %v2885_v34, 0.0 }
 0xb8b   : > { %2183 = vadd.xlane.f32.xlu0 %v2182_v35 }
 0xba1   : > { %2338 = vperm.xlu0 %2869, %v2336_v18  }
 0xc18   : > { %v2184_v36 = vpop.xlane.xlu0 %2183 }
 0xc19   : > { %2886 = vrcp.f32 %v2184_v36 }
 0xc20   : > { %v2339_v41 = vpop.permute.xlu0 %2338 }
 0xc21   : > { %vm2340_vm6 = vcmp.eq.s32.totalorder %v2339_v41, 1 }
 0xc23   : > { %v2887_v37 = vpop.eup %2886 }
 0xc24   : > { %v2186_v38 = vmul.f32 %v2887_v37, %v2885_v34 }
 0xc26   : > { %2748 = vmatmul.mubr.msk.f32.vlgmr.msra.gmra.mrb[16].mxu0 %vm506_vm3, %v2186_v38 }
 0xc27   : > { %2751 = vmatpush3.msra.mxu0 %v2521_v16  ;;  %2752 = vmatprep.mubr.msk.f32.mxu0 %vm2969_vm1, %v2970_v17 }
 0xcf9   : > { %v2256_v39 = vpop.f32.mrb[16].mxu0 }
 0xcfa   : > { %v2749_v40 = vpop.f32.mrb[17].mxu0  ;;  %2753 = vmatmul.mubr.msk.f32.vlgmr.msra.gmra.mrb[10].mxu0 %vm506_vm3, %v2256_v39 }
 0xdcd   : > { %v2331_v42 = vpop.f32.mrb[10].mxu0 }
 0xdce   : > { %v2341_v17 = vsel %vm2340_vm6, 0.0, %v2331_v42  ;;  %v2754_v0 = vpop.f32.mrb[11].mxu0 }
 0xdcf   : > { %2342 = vst.msk [vmem:[%s406_s11] sm:$0xff] %vm1034_vm0, %v2341_v17 }
 0xdd0   : > { %2901 = shalt.err (!%p2898_p5)
}
 0xdd1   : > { %s2902_s27 = scalar_lea.hbm %s3389_s28, 128  ;;  %s2906_s12 = scalar_lea.hbm %s3447_s10, 256 }
 0xdd2   : > { %p2903_p6 = scmp.ne.s32.totalorder %s3389_s28, %s2902_s27  ;;  %p2907_p10 = scmp.lt.u32.totalorder %s3389_s28, %s3447_s10 }
 0xdd3   : > { %p2908_p11 = scmp.lt.u32.totalorder %s2906_s12, %s2902_s27  ;;  %p2910_p13 = scmp.lt.u32.totalorder %s2902_s27, %s3389_s28 }
 0xdd4   : > { %p2904_p7 = pnand %p2903_p6, %p3068_p4 }
 0xdd5   : > { %p2909_p12 = por %p2908_p11, %p2907_p10 }
 0xdd6   : > { %p2905_p9 = pneg %p2904_p7 }
 0xdd7   : > { %p2911_p0 = por %p2910_p13, %p2909_p12 }
 0xdd9   : > { %p2912_p1 = pnand %p2911_p0, %p2905_p9 }
 0xddb   : > { %2915 = shalt.err (!%p2912_p1)
}
 0xddc   : > { %2809 = dma.vmem_to_hbm [thread:$0]  (%p3068_p4), %s3391_s0, 128, %s3389_s28, %s2344_s20  }
 0xddd PF: > { %p2815_p2 = scmp.ge.s32.totalorder %s2966_s18, 2  ;;  %s2370_s16 = sand.u32 1, %s2946_s13  }
 0xdde   : > { %s2371_s24 = scalar_lea.sflag [#allocation5], %s2370_s16 }
 0xddf   : > { %p2812_p3 = pnand %p2815_p2, %p3075_p8 }
 0xde1   : > { %2941 = dma.done.wait (!%p2812_p3), %s2371_s24, 128  }
 0xde2   : > { %2943 = vsyncadd (!%p2812_p3), %s2371_s24, 4294967168  ;;  %s23_s18 = sadd.s32 1, %s2966_s18   ;;  %s3452_s13 = smov %s2950_s14 }
 0xde3   : > { %p20_p5 = scmp.ge.s32.totalorder %s23_s18, 4   ;;  %s3453_s14 = smov %s2954_s15 }
 0xde4   : > { %s3454_s15 = smov %s3081_s26  ;;  %s3455_s16 = smov %s2962_s17 }
 0xde5   : > { %s3456_s17 = smov %s3458_s21  ;;  %22 = sbr.rel (!%p20_p5) target bundleno = 6 (0x6), region = 129 }
 0xdec   :  { %2376 = vsyncpa [#allocation5], 1 }
 0xded   :  { %2378 = vsyncpa [#allocation5 + $0x1], 1 }

</bundles_post_ra>
